<compile_context>
chip_gen: v7x
topology: tpu7x:2x2x1
jax: 0.10.0
libtpu: 0.0.40
codegen_flags: <defaults>
</compile_context>

<pallas_src>
import jax
import jax.numpy as jnp
from jax import lax
from jax.experimental import pallas as pl
from jax.experimental.pallas import tpu as pltpu


def _round_up(x, m):
    return ((x + m - 1) // m) * m


def onehot_dict_kernel(x_ref, dict_ref, o_ref):
    x = x_ref[...]                                   # (tile_n, V_pad) float32
    tile_n, v = x.shape

    # First-occurrence argmax over the last (vocab) axis.
    row_max = jnp.max(x, axis=-1, keepdims=True)     # (tile_n, 1)
    iota = lax.broadcasted_iota(jnp.int32, (tile_n, v), 1)
    idx = jnp.min(jnp.where(x == row_max, iota, v), axis=-1, keepdims=True)

    # One-hot of the argmax index, then embedding lookup as a matmul (MXU).
    one_hot = (iota == idx).astype(dict_ref.dtype)   # (tile_n, V_pad)
    o_ref[...] = jnp.dot(
        one_hot, dict_ref[...], preferred_element_type=jnp.float32
    ).astype(o_ref.dtype)


def one_hot_dictionary(x, dictionary, *, tile_n=None):
    """x: (B, N, V) float, dictionary: (V, E) -> (B, N, E)."""
    B, N, V = x.shape
    V2, E = dictionary.shape
    assert V == V2
    rows = B * N

    # Lane-dense padding: vocab and embedding dims up to multiples of 128.
    V_pad = _round_up(V, 128)
    E_pad = _round_up(E, 128)

    # Row tile: single step for small problems; 512-row tiles otherwise
    # (multiple of 8 sublanes, big per-step DMAs, many grid steps so both
    # TensorCores on v7x get work for realistic B*N).
    if tile_n is None:
        tile_n = rows if rows <= 512 else 512
    tile_n = _round_up(min(tile_n, _round_up(rows, 8)), 8)
    rows_pad = _round_up(rows, tile_n)

    x2d = x.reshape(rows, V)

    # Pad x: extra vocab lanes (and padded rows) get the most-negative value so
    # they never affect the argmax of real rows.
    if jnp.issubdtype(x2d.dtype, jnp.floating):
        neg = jnp.finfo(x2d.dtype).min
    else:
        neg = jnp.iinfo(x2d.dtype).min
    x_p = jnp.full((rows_pad, V_pad), neg, dtype=x2d.dtype)
    x_p = x_p.at[:rows, :V].set(x2d)

    # Pad dictionary with zeros; padded rows are never selected by real rows,
    # padded embedding columns are sliced off below.
    d_p = jnp.zeros((V_pad, E_pad), dtype=dictionary.dtype)
    d_p = d_p.at[:V, :E].set(dictionary)

    grid = (rows_pad // tile_n,)

    out2d = pl.pallas_call(
        onehot_dict_kernel,
        out_shape=jax.ShapeDtypeStruct((rows_pad, E_pad), dictionary.dtype),
        grid_spec=pltpu.PrefetchScalarGridSpec(
            num_scalar_prefetch=0,
            grid=grid,
            in_specs=[
                pl.BlockSpec((tile_n, V_pad), lambda i: (i, 0)),   # x tile
                # Dictionary is resident (constant index_map) — Pallas does not
                # re-fetch it across steps.
                pl.BlockSpec((V_pad, E_pad), lambda i: (0, 0)),
            ],
            out_specs=pl.BlockSpec((tile_n, E_pad), lambda i: (i, 0)),
        ),
        compiler_params=pltpu.CompilerParams(
            dimension_semantics=("parallel",),
        ),
    )(x_p, d_p)

    return out2d[:rows, :E].reshape(B, N, E)


if __name__ == "__main__":
    # Small shapes consistent with the forward: B=2, N=8, vocab=32, emb=64.
    B, N, vocab_size, emb_size = 2, 8, 32, 64

    key = jax.random.PRNGKey(0)
    kx, kd = jax.random.split(key)

    x = jax.random.normal(kx, (B, N, vocab_size), dtype=jnp.float32)
    # nn.Embedding default init: N(0, 1)
    dictionary = jax.random.normal(kd, (vocab_size, emb_size), dtype=jnp.float32)

    out = one_hot_dictionary(x, dictionary)
    out = jax.block_until_ready(out)

    # Reference check in plain JAX.
    tokens = jnp.argmax(x, axis=-1)
    ref = dictionary[tokens]
    assert out.shape == (B, N, emb_size)
    assert jnp.allclose(out, ref, atol=1e-6), "mismatch vs reference"

    print("KERNEL_OK")
</pallas_src>

<mosaic_0001>
module attributes {stable_mosaic.version = 11 : i64} {
  func.func @onehot_dict_kernel(%arg0: i32, %arg1: memref<16x128xf32, #tpu.memory_space<vmem>>, %arg2: memref<128x128xf32, #tpu.memory_space<vmem>>, %arg3: memref<16x128xf32, #tpu.memory_space<vmem>>) attributes {dimension_semantics = [#tpu.dimension_semantics<parallel>], iteration_bounds = array<i64: 1>, scalar_prefetch = 0 : i64, scratch_operands = 0 : i64, tpu.core_type = #tpu.core_type<tc>, window_params = [{transform_indices = @transform_0, window_bounds = array<i64: 16, 128>}, {pipeline_mode = #tpu.pipeline_mode<synchronous>, transform_indices = @transform_1, window_bounds = array<i64: 128, 128>}, {transform_indices = @transform_2, window_bounds = array<i64: 16, 128>}]} {
    %c0 = arith.constant 0 : index
    %c0_0 = arith.constant 0 : index
    %0 = vector.load %arg1[%c0, %c0_0] : memref<16x128xf32, #tpu.memory_space<vmem>>, vector<16x128xf32>
    %cst = arith.constant dense<0xFF800000> : vector<16xf32>
    %1 = vector.multi_reduction <maximumf>, %0, %cst [1] : vector<16x128xf32> to vector<16xf32>
    %2 = vector.shape_cast %1 : vector<16xf32> to vector<16x1xf32>
    %3 = tpu.iota {dimensions = array<i32: 1>} : vector<16x128xi32>
    %4 = vector.broadcast %2 : vector<16x1xf32> to vector<16x128xf32>
    %5 = arith.cmpf oeq, %0, %4 : vector<16x128xf32>
    %c128_i32 = arith.constant 128 : i32
    %6 = vector.broadcast %c128_i32 : i32 to vector<16x128xi32>
    %7 = arith.select %5, %3, %6 : vector<16x128xi1>, vector<16x128xi32>
    %cst_1 = arith.constant dense<2147483647> : vector<16xi32>
    %8 = vector.multi_reduction <minsi>, %7, %cst_1 [1] : vector<16x128xi32> to vector<16xi32>
    %9 = vector.shape_cast %8 : vector<16xi32> to vector<16x1xi32>
    %10 = vector.broadcast %9 : vector<16x1xi32> to vector<16x128xi32>
    %11 = arith.cmpi eq, %3, %10 : vector<16x128xi32>
    %12 = arith.extui %11 : vector<16x128xi1> to vector<16x128xi32>
    %13 = arith.sitofp %12 : vector<16x128xi32> to vector<16x128xf32>
    %c0_2 = arith.constant 0 : index
    %c0_3 = arith.constant 0 : index
    %14 = vector.load %arg2[%c0_2, %c0_3] : memref<128x128xf32, #tpu.memory_space<vmem>>, vector<128x128xf32>
    %cst_4 = arith.constant dense<0.000000e+00> : vector<16x128xf32>
    %15 = tpu.matmul %13, %14, %cst_4 {dimension_numbers = #tpu.dot_dimension_numbers<[1], [0], [0], [1], [0, 0, 1, 1], [], []>} : vector<16x128xf32>, vector<128x128xf32>, vector<16x128xf32> -> vector<16x128xf32>
    %c0_5 = arith.constant 0 : index
    %c0_6 = arith.constant 0 : index
    %16 = vector.load %arg3[%c0_5, %c0_6] : memref<16x128xf32, #tpu.memory_space<vmem>>, vector<16x128xf32>
    tpu.vector_store %arg3[%c0_5, %c0_6], %15 {strides = array<i32>} : memref<16x128xf32, #tpu.memory_space<vmem>>, vector<16x128xf32>,
    return
  }
  func.func @transform_0(%arg0: i32) -> (i32, i32) {
    %c0_i32 = arith.constant 0 : i32
    %c0_i32_0 = arith.constant 0 : i32
    return %arg0, %c0_i32 : i32, i32
  }
  func.func @transform_1(%arg0: i32) -> (i32, i32) {
    %c0_i32 = arith.constant 0 : i32
    %c0_i32_0 = arith.constant 0 : i32
    %c0_i32_1 = arith.constant 0 : i32
    return %c0_i32, %c0_i32_0 : i32, i32
  }
  func.func @transform_2(%arg0: i32) -> (i32, i32) {
    %c0_i32 = arith.constant 0 : i32
    %c0_i32_0 = arith.constant 0 : i32
    return %arg0, %c0_i32 : i32, i32
  }
}

</mosaic_0001>

<bundles_post_ra>
// kernel: tpu_custom_call.1
= control target key start
LH: loop header
LB: loop body
LE: loop exit
PB: predicated region body
PF: predicated region fallthrough
CT: control target
= control target key end

     0   :  { %7 = vsyncpa [#allocation3], 0  ;;  %s436_s0 = inlined_call_operand.hbm [shape: f32[16,128], index: 0, kind: input, shape index: {}]   ;;  %s437_s1 = inlined_call_operand.hbm [shape: f32[128,128], index: 1, kind: input, shape index: {}]   ;;  %s438_s2 = inlined_call_operand.hbm [shape: f32[16,128], index: 2, kind: output, shape index: {}]  }
   0x1   :  { %8 = vsyncpa [#allocation6], 0 }
   0x2   :  { %9 = vsyncpa [#allocation4], 0  ;;  %s364_s9 = smov [#allocation2]   ;;  %s292_s13 = scalar_lea.hbm %s436_s0, 256 }
   0x3   :  { %s15_s10 = sshll.u32 %s364_s9, 4  ;;  %p293_p0 = scmp.ne.s32.totalorder %s436_s0, %s292_s13  ;;  %s16_s10 = int_to_ptr.vmem [resolvable:$true] %s15_s10 }
   0x4   :  { %p296_p1 = scmp.lt.u32.totalorder %s292_s13, %s436_s0 }
   0x6   :  { %p298_p2 = pnand %p296_p1, %p293_p0 }
   0x8   :  { %301 = shalt.err (!%p298_p2)
}
   0x9   :  { %s302_s18 = scalar_lea.vmem %s16_s10, 256  ;;  %p307_p4 = scmp.lt.s32.totalorder %s16_s10, %s16_s10 }
   0xa   :  { %p303_p3 = scmp.ne.s32.totalorder %s16_s10, %s302_s18  ;;  %p308_p5 = scmp.lt.s32.totalorder %s302_s18, %s302_s18 }
   0xc   :  { %p309_p6 = por %p308_p5, %p307_p4 }
   0xe   :  { %p310_p7 = pnand %p309_p6, %p303_p3 }
  0x10   :  { %313 = shalt.err (!%p310_p7)
}
  0x11   :  { %s365_s19 = smov 128   ;;  %s366_s20 = smov 8  }
  0x12   :  { %21 = dma.hbm_to_vmem [thread:$0]  %s436_s0, 256, %s16_s10, [#allocation3], %s365_s19, %s365_s19, %s366_s20  }
  0x13   :  { %s367_s23 = smov [#allocation5]   ;;  %s314_s27 = scalar_lea.hbm %s437_s1, 2048 }
  0x14   :  { %s27_s24 = sshll.u32 %s367_s23, 4  ;;  %p315_p8 = scmp.ne.s32.totalorder %s437_s1, %s314_s27  ;;  %s28_s24 = int_to_ptr.vmem [resolvable:$true] %s27_s24 }
  0x15   :  { %p318_p9 = scmp.lt.u32.totalorder %s314_s27, %s437_s1 }
  0x17   :  { %p320_p10 = pnand %p318_p9, %p315_p8 }
  0x19   :  { %323 = shalt.err (!%p320_p10)
}
  0x1a   :  { %s324_s4 = scalar_lea.vmem %s28_s24, 2048  ;;  %p329_p12 = scmp.lt.s32.totalorder %s28_s24, %s28_s24 }
  0x1b   :  { %p325_p11 = scmp.ne.s32.totalorder %s28_s24, %s324_s4  ;;  %p330_p13 = scmp.lt.s32.totalorder %s324_s4, %s324_s4 }
  0x1d   :  { %p331_p0 = por %p330_p13, %p329_p12 }
  0x1f   :  { %p332_p1 = pnand %p331_p0, %p325_p11 }
  0x21   :  { %335 = shalt.err (!%p332_p1)
}
  0x22   :  { %33 = dma.hbm_to_vmem [thread:$0]  %s437_s1, 2048, %s28_s24, [#allocation6], %s365_s19, %s365_s19, %s366_s20  }
  0x23   :  { %358 = dma.done.wait [#allocation3], 256  }
  0x24   :  { %359 = vsyncadd [#allocation3], 4294967040 }
  0x25   :  { %360 = dma.done.wait [#allocation6], 2048  }
  0x26   :  { %361 = vsyncadd [#allocation6], 4294965248  ;;  %v40_v0 = vld [vmem:[#allocation2] sm:$0xff]  ;;  %v41_v1 = vld [vmem:[#allocation2 + $0x8] sm:$0xff]  ;;  %v46_v2 = vlaneseq  ;;  %v368_v53 = vmov 1.0   ;;  %s369_s1 = smov [#allocation7]  }
  0x27   :  { %42 = vmax.xlane.f32.xlu0 %v40_v0  ;;  %v86_v12 = vld [vmem:[#allocation5] sm:$0xff]  ;;  %v87_v13 = vld [vmem:[#allocation5 + $0x8] sm:$0xff]  ;;  %v88_v14 = vld [vmem:[#allocation5 + $0x10] sm:$0xff]  ;;  %s184_s6 = sshll.u32 %s369_s1, 4  ;;  %s185_s6 = int_to_ptr.vmem [resolvable:$true] %s184_s6 }
  0x28   :  { %v415_v3 = vand.u32 127, %v46_v2  ;;  %v254_v15 = vpack.c.bf16 %v87_v13, %v86_v12  ;;  %v89_v16 = vld [vmem:[#allocation5 + $0x18] sm:$0xff]  ;;  %v90_v18 = vld [vmem:[#allocation5 + $0x20] sm:$0xff]  ;;  %v91_v19 = vld [vmem:[#allocation5 + $0x28] sm:$0xff]  ;;  %s336_s7 = scalar_lea.vmem %s185_s6, 256  ;;  %p341_p3 = scmp.lt.s32.totalorder %s185_s6, %s185_s6 }
  0x29   :  { %v258_v17 = vpack.c.bf16 %v89_v16, %v88_v14  ;;  %v262_v20 = vpack.c.bf16 %v91_v19, %v90_v18  ;;  %v92_v21 = vld [vmem:[#allocation5 + $0x30] sm:$0xff]  ;;  %v93_v22 = vld [vmem:[#allocation5 + $0x38] sm:$0xff]  ;;  %v94_v24 = vld [vmem:[#allocation5 + $0x40] sm:$0xff]  ;;  %p337_p2 = scmp.ne.s32.totalorder %s185_s6, %s336_s7  ;;  %p342_p4 = scmp.lt.s32.totalorder %s336_s7, %s336_s7 }
  0x2a   :  { %255 = vmatprep.subr.bf16.mxu0 %v254_v15  ;;  %v266_v23 = vpack.c.bf16 %v93_v22, %v92_v21  ;;  %v95_v25 = vld [vmem:[#allocation5 + $0x48] sm:$0xff]  ;;  %v96_v27 = vld [vmem:[#allocation5 + $0x50] sm:$0xff]  ;;  %v97_v28 = vld [vmem:[#allocation5 + $0x58] sm:$0xff] }
  0x2b   :  { %44 = vmax.xlane.f32.xlu0 %v41_v1  ;;  %257 = vmatpush3.bf16.msra.mxu0 %v254_v15  ;;  %v270_v26 = vpack.c.bf16 %v95_v25, %v94_v24  ;;  %v274_v29 = vpack.c.bf16 %v97_v28, %v96_v27  ;;  %v98_v38 = vld [vmem:[#allocation5 + $0x60] sm:$0xff]  ;;  %v99_v39 = vld [vmem:[#allocation5 + $0x68] sm:$0xff]  ;;  %v100_v41 = vld [vmem:[#allocation5 + $0x70] sm:$0xff]  ;;  %p343_p5 = por %p342_p4, %p341_p3 }
  0x2c   :  { %259 = vmatprep.subr.bf16.mxu0 %v258_v17  ;;  %v278_v40 = vpack.c.bf16 %v99_v39, %v98_v38  ;;  %v101_v42 = vld [vmem:[#allocation5 + $0x78] sm:$0xff] }
  0x2d   :  { %v282_v43 = vpack.c.bf16 %v101_v42, %v100_v41  ;;  %p344_p6 = pnand %p343_p5, %p337_p2 }
  0x2f   :  { %261 = vmatpush3.bf16.msra.mxu0 %v258_v17 }
  0x30   :  { %263 = vmatprep.subr.bf16.mxu0 %v262_v20 }
  0x33   :  { %265 = vmatpush3.bf16.msra.mxu0 %v262_v20 }
  0x34   :  { %267 = vmatprep.subr.bf16.mxu0 %v266_v23 }
  0x37   :  { %269 = vmatpush3.bf16.msra.mxu0 %v266_v23 }
  0x38   :  { %271 = vmatprep.subr.bf16.mxu0 %v270_v26 }
  0x3b   :  { %273 = vmatpush3.bf16.msra.mxu0 %v270_v26 }
  0x3c   :  { %275 = vmatprep.subr.bf16.mxu0 %v274_v29 }
  0x3f   :  { %277 = vmatpush3.bf16.msra.mxu0 %v274_v29 }
  0x40   :  { %279 = vmatprep.subr.bf16.mxu0 %v278_v40 }
  0x43   :  { %281 = vmatpush3.bf16.msra.mxu0 %v278_v40 }
  0x44   :  { %283 = vmatprep.subr.bf16.mxu0 %v282_v43 }
  0x47   :  { %285 = vmatpush3.bf16.msra.mxu0 %v282_v43 }
  0xb4   :  { %v43_v4 = vpop.xlane.xlu0 %42 }
  0xb5   :  { %vm48_vm0 = vcmp.eq.f32.partialorder %v40_v0, %v43_v4 }
  0xb6   :  { %v50_v5 = vsel %vm48_vm0, %v415_v3, 128 }
  0xb7   :  { %v53_v6 = vshra.s32 %v50_v5, 16  ;;  %v52_v30 = vand.u32 65535, %v50_v5 }
  0xb8   :  { %v45_v7 = vpop.xlane.xlu0 %44 }
  0xb9   :  { %vm49_vm1 = vcmp.eq.f32.partialorder %v41_v1, %v45_v7  ;;  %v55_v8 = vcvt.s32.f32 %v53_v6  ;;  %v54_v33 = vcvt.s32.f32 %v52_v30 }
  0xba   :  { %v51_v9 = vsel %vm49_vm1, %v415_v3, 128 }
  0xbb   :  { %56 = vmin.xlane.f32.xlu1 %v55_v8  ;;  %v67_v10 = vshra.s32 %v51_v9, 16  ;;  %v66_v31 = vand.u32 65535, %v51_v9 }
  0xbd   :  { %v69_v11 = vcvt.s32.f32 %v67_v10  ;;  %v68_v36 = vcvt.s32.f32 %v66_v31 }
  0xbf   :  { %70 = vmin.xlane.f32.xlu1 %v69_v11 }
 0x148   :  { %v57_v32 = vpop.xlane.xlu1 %56 }
 0x149   :  { %vm58_vm2 = vcmp.eq.f32.partialorder %v55_v8, %v57_v32  ;;  %v63_v44 = vcvt.f32.s32 %v57_v32 }
 0x14a   :  { %v59_v34 = vsel %vm58_vm2, %v54_v33, inf }
 0x14b   :  { %60 = vmin.xlane.f32.xlu0 %v59_v34  ;;  %v64_v46 = vshll.u32 %v63_v44, 16 }
 0x14c   :  { %v71_v35 = vpop.xlane.xlu1 %70 }
 0x14d   :  { %vm72_vm3 = vcmp.eq.f32.partialorder %v69_v11, %v71_v35  ;;  %v77_v47 = vcvt.f32.s32 %v71_v35 }
 0x14e   :  { %v73_v37 = vsel %vm72_vm3, %v68_v36, inf }
 0x14f   :  { %74 = vmin.xlane.f32.xlu1 %v73_v37  ;;  %v78_v51 = vshll.u32 %v77_v47, 16 }
 0x1d8   :  { %v61_v45 = vpop.xlane.xlu0 %60 }
 0x1d9   :  { %v62_v48 = vcvt.f32.s32 %v61_v45 }
 0x1db   :  { %v65_v49 = vadd.s32 %v64_v46, %v62_v48 }
 0x1dc   :  { %v75_v50 = vpop.xlane.xlu1 %74 }
 0x1dd   :  { %v76_v52 = vcvt.f32.s32 %v75_v50  ;;  %vm80_vm4 = vcmp.eq.s32.totalorder %v415_v3, %v65_v49 }
 0x1de   :  { %251 = vmatprep.mubr.msk.f32.mxu0 %vm80_vm4, %v368_v53 }
 0x1df   :  { %v79_v54 = vadd.s32 %v78_v51, %v76_v52 }
 0x1e1   :  { %vm81_vm5 = vcmp.eq.s32.totalorder %v415_v3, %v79_v54 }
 0x1e2   :  { %252 = vmatmul.mubr.msk.f32.vlgmr.msra.gmra.mrb[0].mxu0 %vm81_vm5, %v368_v53 }
 0x2b5   :  { %v253_v55 = vpop.f32.mrb[0].mxu0 }
 0x2b6   :  { %178 = vst [vmem:[#allocation7 + $0x8] sm:$0xff] %v253_v55  ;;  %v168_v56 = vpop.f32.mrb[1].mxu0 }
 0x2b7   :  { %177 = vst [vmem:[#allocation7] sm:$0xff] %v168_v56 }
 0x2b8   :  { %347 = shalt.err (!%p344_p6)
}
 0x2b9   :  { %s348_s10 = scalar_lea.hbm %s438_s2, 256 }
 0x2ba   :  { %p349_p7 = scmp.ne.s32.totalorder %s438_s2, %s348_s10  ;;  %p352_p8 = scmp.lt.u32.totalorder %s348_s10, %s438_s2 }
 0x2bc   :  { %p354_p9 = pnand %p352_p8, %p349_p7 }
 0x2be   :  { %357 = shalt.err (!%p354_p9)
}
 0x2bf   :  { %190 = dma.vmem_to_hbm [thread:$0]  %s185_s6, 256, %s438_s2, [#allocation4], %s365_s19, %s365_s19, %s366_s20  }
 0x2c0   :  { %362 = dma.done.wait [#allocation4], 256  }
 0x2c1   :  { %363 = vsyncadd [#allocation4], 4294967040 }
 0x2c2   :  { %194 = vsyncpa [#allocation3], 1 }
 0x2c3   :  { %195 = vsyncpa [#allocation6], 1 }
 0x2c4   :  { %196 = vsyncpa [#allocation4], 1 }

</bundles_post_ra>
